<compile_context>
chip_gen: v5e
topology: v5e:2x2
jax: 0.10.0
libtpu: 0.0.40
codegen_flags: <defaults>
</compile_context>

<pallas_src>
import jax
import jax.numpy as jnp
from jax.experimental import pallas as pl
from jax.experimental.pallas import tpu as pltpu

_LANES = 128
_ROW_ALIGN = 32            # block-row granularity: covers f32(8)/bf16(16)/int8,fp8(32) packing
_MAX_BLOCK_ROWS = 8192     # <= 4 MiB f32 per block buffer (diminishing returns beyond)
_DEFAULT_VMEM_CAP = 64 * 1024 * 1024   # conservative fallback (v7x per-TensorCore VMEM)


def _round_up(x, m):
    return -(-x // m) * m


def _vmem_capacity_bytes():
    try:
        v = getattr(pltpu.get_tpu_info(), "vmem_capacity_bytes", None)
        if isinstance(v, int) and v > 0:
            return v
    except Exception:
        pass
    return _DEFAULT_VMEM_CAP


def _default_num_cores():
    # TODO(synk): use an authoritative TensorCore-count query once exposed; until then
    # default to 1 (optimal on single-TC v5e/v6e; merely single-core on v7x).  The
    # kernel is correct for any value: per-core partials are flushed and summed.
    try:
        info = pltpu.get_tpu_info()
        for name in ("num_cores", "core_count", "num_tensor_cores", "tensorcore_count"):
            v = getattr(info, name, None)
            if isinstance(v, int) and 1 <= v <= 8:
                return v
    except Exception:
        pass
    return 1


def _sublane_pack(dtype):
    return {4: 8, 2: 16, 1: 32}.get(jnp.dtype(dtype).itemsize, 8)


def _to_rows128(x, pad_value, row_align):
    """Lane-dense (rows, 128) view of x (free reshape when x.size is already a
    multiple of row_align*128; otherwise a tiny, zero-contribution pad)."""
    flat = x.reshape(-1)
    n = flat.shape[0]
    align = row_align * _LANES
    rem = n % align
    if rem:
        flat = jnp.pad(flat, (0, align - rem), constant_values=pad_value)
    return flat.reshape(-1, _LANES)


# ---------------------------------------------------------------------------
# Fused kernel body.
# ---------------------------------------------------------------------------
def _emit_segment(seg, in_refs, s, j, last_j, fake_ref, fm_ref, acc_ref):
    start = seg["start"]
    nb = seg["nblocks"]
    mb = seg["block_rows"]
    end = start + nb
    tail_rows = seg["rows"] - (nb - 1) * mb       # rows in the last block, in (0, mb]
    scale = seg["scale"]                          # 1/n, exact Python float
    kind = seg["kind"]
    first = seg["first"]

    @pl.when((s >= start) & (s < end))
    def _():
        if kind == "sq1":
            d = in_refs[first][...].astype(jnp.float32) - 1.0
            contrib = d * d
        else:
            contrib = jnp.abs(
                in_refs[first][...].astype(jnp.float32)
                - in_refs[first + 1][...].astype(jnp.float32))

        if tail_rows == mb:
            # Steady state: pure elementwise VPU add (no mask in the hot loop).
            acc_ref[0:mb, :] += contrib
        else:
            blk = s - start

            @pl.when(blk < nb - 1)
            def _():
                acc_ref[0:mb, :] += contrib

            @pl.when(blk == nb - 1)
            def _():
                # Only the single (statically known) partial tail block is masked;
                # the garbage rows beyond the array are zeroed via select.
                r = jax.lax.broadcasted_iota(jnp.int32, contrib.shape, 0)
                acc_ref[0:mb, :] += jnp.where(r < tail_rows, contrib, 0.0)

        # Flush this term's partial at its last block, and also at the end of this
        # core's sub-grid (keeps a segment split across TensorCores correct).
        @pl.when((s == end - 1) | (j == last_j))
        def _():
            part = jnp.sum(acc_ref[...]) * scale
            if kind == "sq1":
                fake_ref[...] += part
            else:
                fm_ref[...] += part
            acc_ref[...] = jnp.zeros_like(acc_ref)


def _make_fused_kernel(segments, steps_per_core):
    n_in = sum(1 if seg["kind"] == "sq1" else 2 for seg in segments)

    def kernel(*refs):
        in_refs = refs[:n_in]
        fake_ref = refs[n_in]
        fm_ref = refs[n_in + 1]
        acc_ref = refs[n_in + 2]

        i = pl.program_id(0)            # TensorCore split ("parallel")
        j = pl.program_id(1)            # block stream ("arbitrary")
        s = i * steps_per_core + j      # global step
        last_j = steps_per_core - 1

        @pl.when(j == 0)
        def _():
            acc_ref[...] = jnp.zeros_like(acc_ref)
            fake_ref[...] = jnp.zeros_like(fake_ref)
            fm_ref[...] = jnp.zeros_like(fm_ref)

        for seg in segments:            # static Python loop -> K+1 pl.when branches
            _emit_segment(seg, in_refs, s, j, last_j, fake_ref, fm_ref, acc_ref)

    return kernel


# ---------------------------------------------------------------------------
# Driver: one fused pallas_call for pred_fake + all feature-matching layers.
# ---------------------------------------------------------------------------
def _generator_loss_sums(pred_fake, fm_pairs, num_cores=None,
                         max_block_rows=_MAX_BLOCK_ROWS):
    """Returns (loss_fake, loss_fm) with
         loss_fake = mean((pred_fake - 1)^2)
         loss_fm   = sum over (real, fake) pairs of mean(|real - fake|)."""
    arrays = []      # lane-dense (rows, 128) views, kernel-argument order
    segments = []    # static per-term metadata

    def add_segment(kind, views, n_elems):
        segments.append(dict(kind=kind, first=len(arrays),
                             rows=int(views[0].shape[0]),
                             scale=1.0 / float(n_elems)))
        arrays.extend(views)

    add_segment("sq1",
                [_to_rows128(pred_fake, 1, _sublane_pack(pred_fake.dtype))],
                pred_fake.size)
    for real, fake in fm_pairs:
        assert real.shape == fake.shape, "feature-matching tensors must have equal shapes"
        pack = max(_sublane_pack(real.dtype), _sublane_pack(fake.dtype))
        add_segment("l1",
                    [_to_rows128(real, 0, pack), _to_rows128(fake, 0, pack)],
                    real.size)

    # ---- device-aware block sizing (VMEM budget, 128-lane-wide rows) ----
    vmem_cap = _vmem_capacity_bytes()
    budget = max(8 << 20, min(vmem_cap // 3, 40 << 20))
    bytes_per_row = _LANES * 4                                   # f32 accumulator
    for a in arrays:
        bytes_per_row += 2 * _LANES * a.dtype.itemsize           # double-buffered input
    max_rows = max(seg["rows"] for seg in segments)
    mb = budget // bytes_per_row
    mb = min(mb, _MAX_BLOCK_ROWS, int(max_block_rows))
    mb = max(_ROW_ALIGN, (mb // _ROW_ALIGN) * _ROW_ALIGN)
    mb = min(mb, _round_up(max_rows, _ROW_ALIGN))

    total_steps = 0
    for seg in segments:
        seg["block_rows"] = min(mb, seg["rows"])
        seg["nblocks"] = -(-seg["rows"] // seg["block_rows"])
        seg["start"] = total_steps
        total_steps += seg["nblocks"]

    ncores = _default_num_cores() if num_cores is None else int(num_cores)
    ncores = max(1, min(ncores, total_steps))
    spc = -(-total_steps // ncores)                              # steps per core
    acc_rows = max(seg["block_rows"] for seg in segments)

    def make_imap(start, nblocks):
        def imap(i, j):
            s = i * spc + j
            # Clipping keeps the block index constant outside this tensor's segment,
            # so Pallas skips the DMA (no re-fetch) on those steps.
            return (jnp.clip(s - start, 0, nblocks - 1), 0)
        return imap

    in_specs = []
    vmem_needed = acc_rows * _LANES * 4
    a_idx = 0
    for seg in segments:
        for _ in range(1 if seg["kind"] == "sq1" else 2):
            in_specs.append(pl.BlockSpec((seg["block_rows"], _LANES),
                                         make_imap(seg["start"], seg["nblocks"])))
            vmem_needed += 2 * seg["block_rows"] * _LANES * arrays[a_idx].dtype.itemsize
            a_idx += 1

    out_shape = (jax.ShapeDtypeStruct((ncores, 1, 1), jnp.float32),
                 jax.ShapeDtypeStruct((ncores, 1, 1), jnp.float32))
    out_specs = (pl.BlockSpec((1, 1, 1), lambda i, j: (i, 0, 0)),
                 pl.BlockSpec((1, 1, 1), lambda i, j: (i, 0, 0)))

    vmem_limit = int(min(max(vmem_needed + (8 << 20), 32 << 20),
                         max(vmem_cap - (8 << 20), 32 << 20)))

    total_in_bytes = sum(int(a.size) * a.dtype.itemsize for a in arrays)
    total_in_elems = sum(int(a.size) for a in arrays)
    cost = pl.CostEstimate(flops=3 * total_in_elems, transcendentals=0,
                           bytes_accessed=total_in_bytes + 2 * ncores * 4)

    out_fake, out_fm = pl.pallas_call(
        _make_fused_kernel(segments, spc),
        out_shape=out_shape,
        grid_spec=pltpu.PrefetchScalarGridSpec(
            num_scalar_prefetch=0,
            grid=(ncores, spc),
            in_specs=in_specs,
            out_specs=out_specs,
            scratch_shapes=[pltpu.VMEM((acc_rows, _LANES), jnp.float32)],
        ),
        compiler_params=pltpu.CompilerParams(
            dimension_semantics=("parallel", "arbitrary"),
            vmem_limit_bytes=vmem_limit,
        ),
        cost_estimate=cost,
    )(*arrays)

    # Combine the (at most ncores) per-core partials.
    return jnp.sum(out_fake), jnp.sum(out_fm)


# ---------------------------------------------------------------------------
# GeneratorLoss module (thin wrapper over the single fused Pallas launch).
# ---------------------------------------------------------------------------
class GeneratorLoss:
    def __init__(self, fm_loss=False, return_all=False, lam=0, num_cores=None):
        self.fm_loss = fm_loss
        self.return_all = return_all
        self.lam = lam
        self.num_cores = num_cores

    def __call__(self, pred_fake, layer_outputs_real=None, layer_outputs_fake=None):
        pairs = []
        if self.fm_loss:
            assert layer_outputs_real is not None, (
                "Please get layer_outputs from Discriminator.layer_outputs")
            assert layer_outputs_fake is not None, (
                "Please get layer_outputs from Discriminator.layer_outputs")
            for key in layer_outputs_fake.keys():
                pairs.append((layer_outputs_real[key], layer_outputs_fake[key]))

        loss_fake, loss_fm = _generator_loss_sums(pred_fake, pairs, self.num_cores)

        if self.fm_loss:
            if self.return_all:
                return (loss_fake + self.lam * loss_fm, loss_fake, loss_fm)
            return loss_fake + loss_fm
        return loss_fake


if __name__ == "__main__":
    key = jax.random.PRNGKey(0)
    ks = jax.random.split(key, 8)

    # Discriminator patch output (NCHW) + intermediate feature maps.
    pred_fake = jax.random.normal(ks[0], (2, 1, 16, 16), dtype=jnp.float32)
    layer_outputs_real = {
        "layer0": jax.random.normal(ks[1], (2, 8, 16, 16), dtype=jnp.float32),
        "layer1": jax.random.normal(ks[2], (2, 16, 8, 8), dtype=jnp.float32),
        "layer2": jax.random.normal(ks[3], (2, 3, 7, 9), dtype=jnp.float32),  # odd size -> pad path
    }
    layer_outputs_fake = {
        "layer0": jax.random.normal(ks[4], (2, 8, 16, 16), dtype=jnp.float32),
        "layer1": jax.random.normal(ks[5], (2, 16, 8, 8), dtype=jnp.float32),
        "layer2": jax.random.normal(ks[6], (2, 3, 7, 9), dtype=jnp.float32),
    }

    ref_fake = jnp.mean((pred_fake - 1.0) ** 2)
    ref_fm = sum(jnp.mean(jnp.abs(layer_outputs_real[k] - layer_outputs_fake[k]))
                 for k in layer_outputs_fake)

    # 1) Plain generator loss (single-segment fused launch).
    loss_simple = jax.jit(GeneratorLoss())(pred_fake)
    jax.block_until_ready(loss_simple)
    assert jnp.allclose(loss_simple, ref_fake, rtol=1e-5, atol=1e-6)

    # 2) Full loss: feature matching + return_all + lam (one fused launch for all terms).
    full_mod = GeneratorLoss(fm_loss=True, return_all=True, lam=10.0)
    total, loss_fake, loss_fm = jax.jit(lambda p, r, f: full_mod(p, r, f))(
        pred_fake, layer_outputs_real, layer_outputs_fake)
    jax.block_until_ready((total, loss_fake, loss_fm))
    assert jnp.allclose(loss_fake, ref_fake, rtol=1e-5, atol=1e-6)
    assert jnp.allclose(loss_fm, ref_fm, rtol=1e-5, atol=1e-6)
    assert jnp.allclose(total, ref_fake + 10.0 * ref_fm, rtol=1e-5, atol=1e-5)

    # 3) Stress the multi-block + tail-mask + 2-way core-split code paths.
    big_r = jax.random.normal(ks[7], (2, 8, 16, 20), dtype=jnp.float32)  # 5120 elems -> 40 rows
    big_f = big_r * 0.5 + 0.25
    sfake, sfm = jax.jit(lambda p, a, b: _generator_loss_sums(
        p, [(a, b)], num_cores=2, max_block_rows=32))(pred_fake, big_r, big_f)
    jax.block_until_ready((sfake, sfm))
    assert jnp.allclose(sfake, ref_fake, rtol=1e-5, atol=1e-6)
    assert jnp.allclose(sfm, jnp.mean(jnp.abs(big_r - big_f)), rtol=1e-5, atol=1e-6)

    print("KERNEL_OK")
</pallas_src>

<mosaic_0001>
module attributes {stable_mosaic.version = 11 : i64} {
  func.func @kernel(%arg0: i32, %arg1: i32, %arg2: memref<8x128xf32, #tpu.memory_space<vmem>>, %arg3: memref<1x1x1xf32, #tpu.memory_space<vmem>>, %arg4: memref<1x1x1xf32, #tpu.memory_space<vmem>>, %arg5: memref<8x128xf32, #tpu.memory_space<vmem>>) attributes {dimension_semantics = [#tpu.dimension_semantics<parallel>, #tpu.dimension_semantics<arbitrary>], iteration_bounds = array<i64: 1, 1>, scalar_prefetch = 0 : i64, scratch_operands = 1 : i64, tpu.core_type = #tpu.core_type<tc>, window_params = [{transform_indices = @transform_0, window_bounds = array<i64: 8, 128>}, {transform_indices = @transform_1, window_bounds = array<i64: 1, 1, 1>}, {transform_indices = @transform_2, window_bounds = array<i64: 1, 1, 1>}]} {
    %c1_i32 = arith.constant 1 : i32
    %0 = arith.muli %arg0, %c1_i32 : i32
    %1 = arith.addi %0, %arg1 : i32
    %c0_i32 = arith.constant 0 : i32
    %2 = arith.cmpi eq, %arg1, %c0_i32 : i32
    %3 = arith.extui %2 : i1 to i32
    %c0_i32_0 = arith.constant 0 : i32
    %4 = arith.cmpi ne, %3, %c0_i32_0 : i32
    scf.if %4 {
      %cst = arith.constant 0.000000e+00 : f32
      %10 = vector.broadcast %cst : f32 to vector<8x128xf32>
      %c0 = arith.constant 0 : index
      %c0_4 = arith.constant 0 : index
      %11 = vector.load %arg5[%c0, %c0_4] : memref<8x128xf32, #tpu.memory_space<vmem>>, vector<8x128xf32>
      tpu.vector_store %arg5[%c0, %c0_4], %10 {strides = array<i32>} : memref<8x128xf32, #tpu.memory_space<vmem>>, vector<8x128xf32>,
      %cst_5 = arith.constant 0.000000e+00 : f32
      %12 = vector.broadcast %cst_5 : f32 to vector<1x1x1xf32>
      %c0_6 = arith.constant 0 : index
      %c0_7 = arith.constant 0 : index
      %c0_8 = arith.constant 0 : index
      %13 = vector.load %arg3[%c0_6, %c0_7, %c0_8] : memref<1x1x1xf32, #tpu.memory_space<vmem>>, vector<1x1x1xf32>
      tpu.vector_store %arg3[%c0_6, %c0_7, %c0_8], %12 {strides = array<i32>} : memref<1x1x1xf32, #tpu.memory_space<vmem>>, vector<1x1x1xf32>,
      %cst_9 = arith.constant 0.000000e+00 : f32
      %14 = vector.broadcast %cst_9 : f32 to vector<1x1x1xf32>
      %c0_10 = arith.constant 0 : index
      %c0_11 = arith.constant 0 : index
      %c0_12 = arith.constant 0 : index
      %15 = vector.load %arg4[%c0_10, %c0_11, %c0_12] : memref<1x1x1xf32, #tpu.memory_space<vmem>>, vector<1x1x1xf32>
      tpu.vector_store %arg4[%c0_10, %c0_11, %c0_12], %14 {strides = array<i32>} : memref<1x1x1xf32, #tpu.memory_space<vmem>>, vector<1x1x1xf32>,
    } else {
    }
    %c0_i32_1 = arith.constant 0 : i32
    %5 = arith.cmpi sge, %1, %c0_i32_1 : i32
    %c1_i32_2 = arith.constant 1 : i32
    %6 = arith.cmpi slt, %1, %c1_i32_2 : i32
    %7 = arith.andi %5, %6 : i1
    %8 = arith.extui %7 : i1 to i32
    %c0_i32_3 = arith.constant 0 : i32
    %9 = arith.cmpi ne, %8, %c0_i32_3 : i32
    scf.if %9 {
      %c0 = arith.constant 0 : index
      %c0_4 = arith.constant 0 : index
      %10 = vector.load %arg2[%c0, %c0_4] : memref<8x128xf32, #tpu.memory_space<vmem>>, vector<8x128xf32>
      %cst = arith.constant 1.000000e+00 : f32
      %11 = vector.broadcast %cst : f32 to vector<8x128xf32>
      %12 = arith.subf %10, %11 : vector<8x128xf32>
      %13 = arith.mulf %12, %12 : vector<8x128xf32>
      %c0_5 = arith.constant 0 : index
      %c0_6 = arith.constant 0 : index
      %14 = vector.load %arg5[%c0_5, %c0_6] : memref<8x128xf32, #tpu.memory_space<vmem>>, vector<8x128xf32>
      %15 = arith.addf %14, %13 : vector<8x128xf32>
      %c0_7 = arith.constant 0 : index
      %c0_8 = arith.constant 0 : index
      %16 = vector.load %arg5[%c0_7, %c0_8] : memref<8x128xf32, #tpu.memory_space<vmem>>, vector<8x128xf32>
      tpu.vector_store %arg5[%c0_7, %c0_8], %15 {strides = array<i32>} : memref<8x128xf32, #tpu.memory_space<vmem>>, vector<8x128xf32>,
      %c0_i32_9 = arith.constant 0 : i32
      %17 = arith.cmpi eq, %1, %c0_i32_9 : i32
      %c0_i32_10 = arith.constant 0 : i32
      %18 = arith.cmpi eq, %arg1, %c0_i32_10 : i32
      %19 = arith.ori %17, %18 : i1
      %20 = arith.extui %19 : i1 to i32
      %c0_i32_11 = arith.constant 0 : i32
      %21 = arith.cmpi ne, %20, %c0_i32_11 : i32
      scf.if %21 {
        %c0_12 = arith.constant 0 : index
        %c0_13 = arith.constant 0 : index
        %22 = vector.load %arg5[%c0_12, %c0_13] : memref<8x128xf32, #tpu.memory_space<vmem>>, vector<8x128xf32>
        %23 = vector.shape_cast %22 : vector<8x128xf32> to vector<1x8x128xf32>
        %cst_14 = arith.constant dense<0.000000e+00> : vector<1xf32>
        %24 = vector.multi_reduction <add>, %23, %cst_14 [1, 2] : vector<1x8x128xf32> to vector<1xf32>
        %25 = vector.shape_cast %24 : vector<1xf32> to vector<1x1x1xf32>
        %26 = vector.extract %25[0, 0, 0] : f32 from vector<1x1x1xf32>
        %cst_15 = arith.constant 0.001953125 : f32
        %27 = arith.mulf %26, %cst_15 : f32
        %c0_16 = arith.constant 0 : index
        %c0_17 = arith.constant 0 : index
        %c0_18 = arith.constant 0 : index
        %28 = vector.load %arg3[%c0_16, %c0_17, %c0_18] : memref<1x1x1xf32, #tpu.memory_space<vmem>>, vector<1x1x1xf32>
        %29 = vector.broadcast %27 : f32 to vector<1x1x1xf32>
        %30 = arith.addf %28, %29 : vector<1x1x1xf32>
        %c0_19 = arith.constant 0 : index
        %c0_20 = arith.constant 0 : index
        %c0_21 = arith.constant 0 : index
        %31 = vector.load %arg3[%c0_19, %c0_20, %c0_21] : memref<1x1x1xf32, #tpu.memory_space<vmem>>, vector<1x1x1xf32>
        tpu.vector_store %arg3[%c0_19, %c0_20, %c0_21], %30 {strides = array<i32>} : memref<1x1x1xf32, #tpu.memory_space<vmem>>, vector<1x1x1xf32>,
        %cst_22 = arith.constant 0.000000e+00 : f32
        %32 = vector.broadcast %cst_22 : f32 to vector<8x128xf32>
        %c0_23 = arith.constant 0 : index
        %c0_24 = arith.constant 0 : index
        %33 = vector.load %arg5[%c0_23, %c0_24] : memref<8x128xf32, #tpu.memory_space<vmem>>, vector<8x128xf32>
        tpu.vector_store %arg5[%c0_23, %c0_24], %32 {strides = array<i32>} : memref<8x128xf32, #tpu.memory_space<vmem>>, vector<8x128xf32>,
      } else {
      }
    } else {
    }
    return
  }
  func.func @transform_0(%arg0: i32, %arg1: i32) -> (i32, i32) {
    %c1_i32 = arith.constant 1 : i32
    %0 = arith.muli %arg0, %c1_i32 : i32
    %1 = arith.addi %0, %arg1 : i32
    %c0_i32 = arith.constant 0 : i32
    %2 = arith.subi %1, %c0_i32 : i32
    %c0_i32_0 = arith.constant 0 : i32
    %c0_i32_1 = arith.constant 0 : i32
    %3 = arith.maxsi %c0_i32_0, %2 : i32
    %4 = arith.minsi %c0_i32_1, %3 : i32
    %c0_i32_2 = arith.constant 0 : i32
    %c0_i32_3 = arith.constant 0 : i32
    return %4, %c0_i32_2 : i32, i32
  }
  func.func @transform_1(%arg0: i32, %arg1: i32) -> (i32, i32, i32) {
    %c0_i32 = arith.constant 0 : i32
    %c0_i32_0 = arith.constant 0 : i32
    %c0_i32_1 = arith.constant 0 : i32
    return %arg0, %c0_i32, %c0_i32_0 : i32, i32, i32
  }
  func.func @transform_2(%arg0: i32, %arg1: i32) -> (i32, i32, i32) {
    %c0_i32 = arith.constant 0 : i32
    %c0_i32_0 = arith.constant 0 : i32
    %c0_i32_1 = arith.constant 0 : i32
    return %arg0, %c0_i32, %c0_i32_0 : i32, i32, i32
  }
}

</mosaic_0001>

<bundles_post_ra>
// kernel: _unnamed_function_.1
= control target key start
LH: loop header
LB: loop body
LE: loop exit
PB: predicated region body
PF: predicated region fallthrough
CT: control target
= control target key end

     0   :  { %8 = vsyncpa [#allocation4], 0  ;;  %s218_s0 = inlined_call_operand.vmem [shape: f32[8,128], index: 0, kind: input, shape index: {}]   ;;  %s219_s1 = inlined_call_operand.hbm [shape: f32[1,1,1], index: 1, kind: output, shape index: {0}]   ;;  %s220_s2 = inlined_call_operand.hbm [shape: f32[1,1,1], index: 2, kind: output, shape index: {1}]  }
   0x1   :  { %v64_v0 = vld [vmem:[%s218_s0] sm:$0xff] }
   0x2   :  { %9 = vsyncpa [#allocation6], 0  ;;  %v130_v1 = vadd.f32 -1.0, %v64_v0  ;;  %s188_s11 = smov [#allocation5]   ;;  %s110_s15 = sshll.u32 %s220_s2, 4  ;;  %vm55_vm0 = vcmask 0   ;;  %s111_s15 = int_to_ptr.hbm [resolvable:$true] %s110_s15 }
   0x3   :  { %s108_s12 = sshll.u32 %s188_s11, 4  ;;  %v189_v3 = vmov 0.0   ;;  %s190_s16 = smov [#allocation3]   ;;  %s109_s12 = int_to_ptr.vmem [resolvable:$true] %s108_s12 }
   0x4   :  { %v66_v2 = vmul.f32 %v130_v1, %v130_v1  ;;  %56 = vst.msk [vmem:[#allocation3] sm:$0x1] %vm55_vm0, %v189_v3  ;;  %s97_s2 = sshll.u32 %s190_s16, 4  ;;  %s99_s20 = sshll.u32 %s219_s1, 4  ;;  %s98_s2 = int_to_ptr.vmem [resolvable:$true] %s97_s2  ;;  %s100_s20 = int_to_ptr.hbm [resolvable:$true] %s99_s20 }
   0x5   :  { %57 = vst.msk [vmem:[#allocation5] sm:$0x1] %vm55_vm0, %v189_v3 }
   0x6   :  { %76 = vadd.xlane.f32.xlu0 %v66_v2  ;;  %113 = dma.vmem_to_hbm [thread:$0]  %s109_s12, 16, %s111_s15, [#allocation6]  }
   0xb   :  { %v86_v11 = vld [vmem:[#allocation3] sm:$0x1] }
  0x79   :  { %v77_v4 = vpop.xlane.xlu0 %76 }
  0x7a   :  { %v78_v5 = vrot.slane %v77_v4, 4 }
  0x7c   :  { %v79_v6 = vadd.f32 %v78_v5, %v77_v4 }
  0x7e   :  { %v80_v7 = vrot.slane %v79_v6, 2 }
  0x80   :  { %v81_v8 = vadd.f32 %v80_v7, %v79_v6 }
  0x82   :  { %v82_v9 = vrot.slane %v81_v8, 1 }
  0x84   :  { %v83_v10 = vadd.f32 %v82_v9, %v81_v8 }
  0x86   :  { %131 = vpush %v83_v10 }
  0xb7   :  { %s132_s0 = spop %131 }
  0xb8   :  { %s85_s17 = smul.f32 0.001953125, %s132_s0 }
  0xba   :  { %v87_v12 = vstv %s85_s17 }
  0xbb   :  { %v88_v13 = vadd.f32 %v87_v12, %v86_v11 }
  0xbd   :  { %90 = vst.msk [vmem:[#allocation3] sm:$0x1] %vm55_vm0, %v88_v13 }
  0xbe   :  { %102 = dma.vmem_to_hbm [thread:$0]  %s98_s2, 16, %s100_s20, [#allocation4]  }
  0xbf   :  { %184 = dma.done.wait [#allocation4], 16  }
  0xc0   :  { %185 = vsyncadd [#allocation4], 4294967280 }
  0xc1   :  { %186 = dma.done.wait [#allocation6], 16  }
  0xc2   :  { %187 = vsyncadd [#allocation6], 4294967280 }
  0xc3   :  { %122 = vsyncpa [#allocation4], 1 }
  0xc4   :  { %123 = vsyncpa [#allocation6], 1 }

</bundles_post_ra>
